<compile_context>
chip_gen: v7x
topology: tpu7x:2x2x1
jax: 0.10.0
libtpu: 0.0.40
codegen_flags: <defaults>
</compile_context>

<pallas_src>
import jax
import jax.numpy as jnp
from jax.experimental import pallas as pl
from jax.experimental.pallas import tpu as pltpu

HID1 = 400          # obs_net hidden size
HID2 = 300          # out_net hidden size
HID1_PAD = 512      # lane-padded hidden sizes (zero padding -> exact)
HID2_PAD = 384


def _round_up(n, m):
    return ((n + m - 1) // m) * m


def _cdiv(a, b):
    return -(-a // b)


def _d4pg_critic_kernel(x_ref, a_ref, w1_ref, b1_ref, w2o_ref, w2a_ref, b2_ref,
                        w3_ref, b3_ref, sup2_ref, distr_ref, q_ref):
    # Inputs arrive f32; cast to bf16 right before the MXU (free VPU filler).
    x = x_ref[...].astype(jnp.bfloat16)          # [tb, obs]
    a = a_ref[...].astype(jnp.bfloat16)          # [tb, act]

    # obs_net: Linear(obs, 400->512 padded) + ReLU. Padded cols stay exactly 0.
    h1 = jnp.dot(x, w1_ref[...], preferred_element_type=jnp.float32) + b1_ref[...]
    h1 = jnp.maximum(h1, 0.0)

    # out_net layer 1: Linear(400+act, 300->384 padded) + ReLU.
    # cat([obs, a]) @ W2 == obs @ W2_obs + a @ W2_act (exact split).
    h2 = (jnp.dot(h1.astype(jnp.bfloat16), w2o_ref[...],
                  preferred_element_type=jnp.float32)
          + jnp.dot(a, w2a_ref[...], preferred_element_type=jnp.float32)
          + b2_ref[...])
    h2 = jnp.maximum(h2, 0.0)

    # out_net layer 2: Linear(300, n_atoms padded to 128) -> distribution logits.
    # Padded atom columns carry bias -1e30 so exp() below makes them exactly 0.
    logits = (jnp.dot(h2.astype(jnp.bfloat16), w3_ref[...],
                      preferred_element_type=jnp.float32) + b3_ref[...])
    distr_ref[...] = logits.astype(distr_ref.dtype)          # bf16 writeback

    # Fused distr_to_q: numerically-stable softmax, then weighted sum with the
    # supports. The [2, n_atoms_pad] @ [n_atoms_pad, tb] matmul produces both
    # the weighted numerator (row 0) and the softmax denominator (row 1)
    # already lane-major, so the q store is a dense [1, tb] row.
    m = jnp.max(logits, axis=-1, keepdims=True)
    p = jnp.exp(logits - m)                                   # EUP; pads -> 0
    ws = jnp.dot(sup2_ref[...], p.T, preferred_element_type=jnp.float32)  # [2, tb]
    q_row = ws[0:1, :] * pl.reciprocal(ws[1:2, :], approx=False)
    q_ref[...] = q_row.astype(q_ref.dtype)


def init_params(key, obs_size, act_size, n_atoms):
    """Deterministic init mimicking nn.Linear's default U(-1/sqrt(fan_in), ...)."""
    ks = jax.random.split(key, 6)

    def unif(k, shape, fan_in):
        bound = 1.0 / jnp.sqrt(jnp.float32(fan_in))
        return jax.random.uniform(k, shape, jnp.float32, -bound, bound)

    w1 = unif(ks[0], (obs_size, HID1), obs_size)
    b1 = unif(ks[1], (1, HID1), obs_size)
    fan2 = HID1 + act_size
    w2_full = unif(ks[2], (fan2, HID2), fan2)
    w2o = w2_full[:HID1]
    w2a = w2_full[HID1:]
    b2 = unif(ks[3], (1, HID2), fan2)
    w3 = unif(ks[4], (HID2, n_atoms), HID2)
    b3 = unif(ks[5], (1, n_atoms), HID2)
    return (w1, b1, w2o, w2a, b2, w3, b3)


def prepare_params(params, n_atoms, v_min, v_max):
    """One-time transform: bf16 weights, lane-padded dims, supports/ones rows.

    Zero padding of hidden dims keeps the real outputs bit-identical
    (padded activations are ReLU(0)=0). Padded atom bias columns are -1e30 so
    they vanish in the fused softmax; padded supports/ones entries are 0.
    """
    w1, b1, w2o, w2a, b2, w3, b3 = params
    n_pad = _round_up(n_atoms, 128)
    pa = n_pad - n_atoms
    p1 = HID1_PAD - HID1
    p2 = HID2_PAD - HID2

    w1p = jnp.pad(w1, ((0, 0), (0, p1)))
    b1p = jnp.pad(b1, ((0, 0), (0, p1)))
    w2op = jnp.pad(w2o, ((0, p1), (0, p2)))
    w2ap = jnp.pad(w2a, ((0, 0), (0, p2)))
    b2p = jnp.pad(b2, ((0, 0), (0, p2)))
    w3p = jnp.pad(w3, ((0, p2), (0, pa)))
    b3p = jnp.pad(b3, ((0, 0), (0, pa)), constant_values=-1e30)

    supports = jnp.linspace(v_min, v_max, n_atoms, dtype=jnp.float32)
    sup_row = jnp.pad(supports, (0, pa))
    ones_row = jnp.pad(jnp.ones((n_atoms,), jnp.float32), (0, pa))
    sup2 = jnp.stack([sup_row, ones_row], axis=0)             # [2, n_pad]

    bf16 = jnp.bfloat16
    return (w1p.astype(bf16), b1p.astype(jnp.float32),
            w2op.astype(bf16), w2ap.astype(bf16), b2p.astype(jnp.float32),
            w3p.astype(bf16), b3p.astype(jnp.float32), sup2)


def _choose_batch_tile(B, block_b):
    """Tile size / count: one full tile for small B, else >=2 tiles (v7x
    megacore) whose size is a multiple of 128 (keeps the lane-dense q output
    BlockSpec aligned)."""
    if B <= 128:
        tb = _round_up(max(B, 1), 8)
        return tb, 1
    num_tiles = max(_cdiv(B, block_b), 2)
    tb = _round_up(_cdiv(B, num_tiles), 128)
    num_tiles = _cdiv(B, tb)
    return tb, num_tiles


def d4pg_critic_forward(x, a, prepared, n_atoms, *, block_b=512):
    """D4PGCritic forward (+ fused distr_to_q) as one Pallas kernel.

    x: [B, obs_size] f32, a: [B, act_size] f32.
    Returns (distr logits [B, n_atoms] f32, q [B, 1] f32).
    """
    w1, b1, w2o, w2a, b2, w3, b3, sup2 = prepared
    B, obs_size = x.shape
    act_size = a.shape[1]
    n_pad = w3.shape[1]

    tb, num_tiles = _choose_batch_tile(B, block_b)
    b_pad = tb * num_tiles
    if b_pad != B:
        x = jnp.pad(x, ((0, b_pad - B), (0, 0)))
        a = jnp.pad(a, ((0, b_pad - B), (0, 0)))

    def resident(arr):
        # Constant block index => weights DMA'd into VMEM once, resident
        # across all batch tiles.
        return pl.BlockSpec(arr.shape, lambda i: (0,) * arr.ndim)

    distr, q = pl.pallas_call(
        _d4pg_critic_kernel,
        out_shape=(jax.ShapeDtypeStruct((b_pad, n_pad), jnp.bfloat16),
                   jax.ShapeDtypeStruct((1, b_pad), jnp.float32)),
        grid=(num_tiles,),
        in_specs=[
            pl.BlockSpec((tb, obs_size), lambda i: (i, 0)),
            pl.BlockSpec((tb, act_size), lambda i: (i, 0)),
            resident(w1), resident(b1),
            resident(w2o), resident(w2a), resident(b2),
            resident(w3), resident(b3), resident(sup2),
        ],
        out_specs=(pl.BlockSpec((tb, n_pad), lambda i: (i, 0)),
                   pl.BlockSpec((1, tb), lambda i: (0, i))),
        compiler_params=pltpu.CompilerParams(
            dimension_semantics=("parallel",)),   # both TCs on v7x when >=2 tiles
    )(x, a, w1, b1, w2o, w2a, b2, w3, b3, sup2)

    distr = distr[:B, :n_atoms].astype(jnp.float32)
    q = q[0, :B].reshape(B, 1)
    return distr, q


def reference_forward(x, a, params, n_atoms, v_min, v_max):
    """Pure-JAX reference mirroring the kernel's bf16-input / f32-accum numerics."""
    w1, b1, w2o, w2a, b2, w3, b3 = params

    def bf(t):  # round to bf16 like the kernel's MXU inputs, compute in f32
        return t.astype(jnp.bfloat16).astype(jnp.float32)

    xb, ab = bf(x), bf(a)
    h1 = jnp.maximum(xb @ bf(w1) + b1, 0.0)
    h2 = jnp.maximum(bf(h1) @ bf(w2o) + ab @ bf(w2a) + b2, 0.0)
    logits = bf(h2) @ bf(w3) + b3
    supports = jnp.linspace(v_min, v_max, n_atoms, dtype=jnp.float32)
    p = jax.nn.softmax(logits, axis=-1)
    q = jnp.sum(p * supports, axis=-1, keepdims=True)
    return logits, q


if __name__ == "__main__":
    # Small, module-consistent shapes (MuJoCo Ant-ish).
    B = 4
    obs_size = 24
    act_size = 8
    n_atoms = 51
    v_min, v_max = -10.0, 10.0

    key = jax.random.PRNGKey(0)
    kx, ka, kp = jax.random.split(key, 3)
    x = jax.random.normal(kx, (B, obs_size), jnp.float32)
    a = jax.random.normal(ka, (B, act_size), jnp.float32)
    params = init_params(kp, obs_size, act_size, n_atoms)
    prepared = prepare_params(params, n_atoms, v_min, v_max)

    distr, q = d4pg_critic_forward(x, a, prepared, n_atoms)
    distr, q = jax.block_until_ready((distr, q))

    ref_distr, ref_q = reference_forward(x, a, params, n_atoms, v_min, v_max)
    assert distr.shape == (B, n_atoms)
    assert q.shape == (B, 1)
    assert jnp.allclose(distr, ref_distr, atol=1e-2, rtol=1e-2), "distr mismatch"
    assert jnp.allclose(q, ref_q, atol=1e-2, rtol=1e-2), "q mismatch"

    print("KERNEL_OK")
</pallas_src>

<mosaic_0001>
module attributes {stable_mosaic.version = 11 : i64} {
  func.func @_d4pg_critic_kernel(%arg0: i32, %arg1: memref<8x24xf32, #tpu.memory_space<vmem>>, %arg2: memref<8x8xf32, #tpu.memory_space<vmem>>, %arg3: memref<24x512xbf16, #tpu.memory_space<vmem>>, %arg4: memref<1x512xf32, #tpu.memory_space<vmem>>, %arg5: memref<512x384xbf16, #tpu.memory_space<vmem>>, %arg6: memref<8x384xbf16, #tpu.memory_space<vmem>>, %arg7: memref<1x384xf32, #tpu.memory_space<vmem>>, %arg8: memref<384x128xbf16, #tpu.memory_space<vmem>>, %arg9: memref<1x128xf32, #tpu.memory_space<vmem>>, %arg10: memref<2x128xf32, #tpu.memory_space<vmem>>, %arg11: memref<8x128xbf16, #tpu.memory_space<vmem>>, %arg12: memref<1x8xf32, #tpu.memory_space<vmem>>) attributes {dimension_semantics = [#tpu.dimension_semantics<parallel>], iteration_bounds = array<i64: 1>, scalar_prefetch = 0 : i64, scratch_operands = 0 : i64, tpu.core_type = #tpu.core_type<tc>, window_params = [{transform_indices = @transform_0, window_bounds = array<i64: 8, 24>}, {transform_indices = @transform_1, window_bounds = array<i64: 8, 8>}, {pipeline_mode = #tpu.pipeline_mode<synchronous>, transform_indices = @transform_2, window_bounds = array<i64: 24, 512>}, {pipeline_mode = #tpu.pipeline_mode<synchronous>, transform_indices = @transform_3, window_bounds = array<i64: 1, 512>}, {pipeline_mode = #tpu.pipeline_mode<synchronous>, transform_indices = @transform_4, window_bounds = array<i64: 512, 384>}, {pipeline_mode = #tpu.pipeline_mode<synchronous>, transform_indices = @transform_5, window_bounds = array<i64: 8, 384>}, {pipeline_mode = #tpu.pipeline_mode<synchronous>, transform_indices = @transform_6, window_bounds = array<i64: 1, 384>}, {pipeline_mode = #tpu.pipeline_mode<synchronous>, transform_indices = @transform_7, window_bounds = array<i64: 384, 128>}, {pipeline_mode = #tpu.pipeline_mode<synchronous>, transform_indices = @transform_8, window_bounds = array<i64: 1, 128>}, {pipeline_mode = #tpu.pipeline_mode<synchronous>, transform_indices = @transform_9, window_bounds = array<i64: 2, 128>}, {transform_indices = @transform_10, window_bounds = array<i64: 8, 128>}, {transform_indices = @transform_11, window_bounds = array<i64: 1, 8>}]} {
    %c0 = arith.constant 0 : index
    %c0_0 = arith.constant 0 : index
    %0 = vector.load %arg1[%c0, %c0_0] : memref<8x24xf32, #tpu.memory_space<vmem>>, vector<8x24xf32>
    %1 = arith.truncf %0 : vector<8x24xf32> to vector<8x24xbf16>
    %c0_1 = arith.constant 0 : index
    %c0_2 = arith.constant 0 : index
    %2 = vector.load %arg2[%c0_1, %c0_2] : memref<8x8xf32, #tpu.memory_space<vmem>>, vector<8x8xf32>
    %3 = arith.truncf %2 : vector<8x8xf32> to vector<8x8xbf16>
    %c0_3 = arith.constant 0 : index
    %c0_4 = arith.constant 0 : index
    %4 = vector.load %arg3[%c0_3, %c0_4] : memref<24x512xbf16, #tpu.memory_space<vmem>>, vector<24x512xbf16>
    %cst = arith.constant dense<0.000000e+00> : vector<8x512xf32>
    %5 = tpu.matmul %1, %4, %cst {dimension_numbers = #tpu.dot_dimension_numbers<[1], [0], [0], [1], [0, 0, 1, 1], [], []>} : vector<8x24xbf16>, vector<24x512xbf16>, vector<8x512xf32> -> vector<8x512xf32>
    %c0_5 = arith.constant 0 : index
    %c0_6 = arith.constant 0 : index
    %6 = vector.load %arg4[%c0_5, %c0_6] : memref<1x512xf32, #tpu.memory_space<vmem>>, vector<1x512xf32>
    %7 = vector.broadcast %6 : vector<1x512xf32> to vector<8x512xf32>
    %8 = arith.addf %5, %7 : vector<8x512xf32>
    %cst_7 = arith.constant 0.000000e+00 : f32
    %9 = vector.broadcast %cst_7 : f32 to vector<8x512xf32>
    %10 = arith.maximumf %8, %9 : vector<8x512xf32>
    %11 = arith.truncf %10 : vector<8x512xf32> to vector<8x512xbf16>
    %c0_8 = arith.constant 0 : index
    %c0_9 = arith.constant 0 : index
    %12 = vector.load %arg5[%c0_8, %c0_9] : memref<512x384xbf16, #tpu.memory_space<vmem>>, vector<512x384xbf16>
    %cst_10 = arith.constant dense<0.000000e+00> : vector<8x384xf32>
    %13 = tpu.matmul %11, %12, %cst_10 {dimension_numbers = #tpu.dot_dimension_numbers<[1], [0], [0], [1], [0, 0, 1, 1], [], []>} : vector<8x512xbf16>, vector<512x384xbf16>, vector<8x384xf32> -> vector<8x384xf32>
    %c0_11 = arith.constant 0 : index
    %c0_12 = arith.constant 0 : index
    %14 = vector.load %arg6[%c0_11, %c0_12] : memref<8x384xbf16, #tpu.memory_space<vmem>>, vector<8x384xbf16>
    %cst_13 = arith.constant dense<0.000000e+00> : vector<8x384xf32>
    %15 = tpu.matmul %3, %14, %cst_13 {dimension_numbers = #tpu.dot_dimension_numbers<[1], [0], [0], [1], [0, 0, 1, 1], [], []>} : vector<8x8xbf16>, vector<8x384xbf16>, vector<8x384xf32> -> vector<8x384xf32>
    %16 = arith.addf %13, %15 : vector<8x384xf32>
    %c0_14 = arith.constant 0 : index
    %c0_15 = arith.constant 0 : index
    %17 = vector.load %arg7[%c0_14, %c0_15] : memref<1x384xf32, #tpu.memory_space<vmem>>, vector<1x384xf32>
    %18 = vector.broadcast %17 : vector<1x384xf32> to vector<8x384xf32>
    %19 = arith.addf %16, %18 : vector<8x384xf32>
    %cst_16 = arith.constant 0.000000e+00 : f32
    %20 = vector.broadcast %cst_16 : f32 to vector<8x384xf32>
    %21 = arith.maximumf %19, %20 : vector<8x384xf32>
    %22 = arith.truncf %21 : vector<8x384xf32> to vector<8x384xbf16>
    %c0_17 = arith.constant 0 : index
    %c0_18 = arith.constant 0 : index
    %23 = vector.load %arg8[%c0_17, %c0_18] : memref<384x128xbf16, #tpu.memory_space<vmem>>, vector<384x128xbf16>
    %cst_19 = arith.constant dense<0.000000e+00> : vector<8x128xf32>
    %24 = tpu.matmul %22, %23, %cst_19 {dimension_numbers = #tpu.dot_dimension_numbers<[1], [0], [0], [1], [0, 0, 1, 1], [], []>} : vector<8x384xbf16>, vector<384x128xbf16>, vector<8x128xf32> -> vector<8x128xf32>
    %c0_20 = arith.constant 0 : index
    %c0_21 = arith.constant 0 : index
    %25 = vector.load %arg9[%c0_20, %c0_21] : memref<1x128xf32, #tpu.memory_space<vmem>>, vector<1x128xf32>
    %26 = vector.broadcast %25 : vector<1x128xf32> to vector<8x128xf32>
    %27 = arith.addf %24, %26 : vector<8x128xf32>
    %28 = arith.truncf %27 : vector<8x128xf32> to vector<8x128xbf16>
    %c0_22 = arith.constant 0 : index
    %c0_23 = arith.constant 0 : index
    %29 = vector.load %arg11[%c0_22, %c0_23] : memref<8x128xbf16, #tpu.memory_space<vmem>>, vector<8x128xbf16>
    tpu.vector_store %arg11[%c0_22, %c0_23], %28 {strides = array<i32>} : memref<8x128xbf16, #tpu.memory_space<vmem>>, vector<8x128xbf16>,
    %cst_24 = arith.constant dense<0xFF800000> : vector<8xf32>
    %30 = vector.multi_reduction <maximumf>, %27, %cst_24 [1] : vector<8x128xf32> to vector<8xf32>
    %31 = vector.shape_cast %30 : vector<8xf32> to vector<8x1xf32>
    %32 = vector.broadcast %31 : vector<8x1xf32> to vector<8x128xf32>
    %33 = arith.subf %27, %32 : vector<8x128xf32>
    %34 = math.exp %33 : vector<8x128xf32>
    %c0_25 = arith.constant 0 : index
    %c0_26 = arith.constant 0 : index
    %35 = vector.load %arg10[%c0_25, %c0_26] : memref<2x128xf32, #tpu.memory_space<vmem>>, vector<2x128xf32>
    %36 = tpu.transpose %34, [1, 0] : vector<8x128xf32> -> vector<128x8xf32>
    %cst_27 = arith.constant dense<0.000000e+00> : vector<2x8xf32>
    %37 = tpu.matmul %35, %36, %cst_27 {dimension_numbers = #tpu.dot_dimension_numbers<[1], [0], [0], [1], [0, 0, 1, 1], [], []>} : vector<2x128xf32>, vector<128x8xf32>, vector<2x8xf32> -> vector<2x8xf32>
    %38 = vector.extract_strided_slice %37 {offsets = [0, 0], sizes = [1, 8], strides = [1, 1]} : vector<2x8xf32> to vector<1x8xf32>
    %39 = vector.extract_strided_slice %37 {offsets = [1, 0], sizes = [1, 8], strides = [1, 1]} : vector<2x8xf32> to vector<1x8xf32>
    %40 = tpu.reciprocal %39 : vector<1x8xf32> -> vector<1x8xf32>
    %41 = arith.mulf %38, %40 : vector<1x8xf32>
    %c0_28 = arith.constant 0 : index
    %c0_29 = arith.constant 0 : index
    %42 = vector.load %arg12[%c0_28, %c0_29] : memref<1x8xf32, #tpu.memory_space<vmem>>, vector<1x8xf32>
    tpu.vector_store %arg12[%c0_28, %c0_29], %41 {strides = array<i32>} : memref<1x8xf32, #tpu.memory_space<vmem>>, vector<1x8xf32>,
    return
  }
  func.func @transform_0(%arg0: i32) -> (i32, i32) {
    %c0_i32 = arith.constant 0 : i32
    %c0_i32_0 = arith.constant 0 : i32
    return %arg0, %c0_i32 : i32, i32
  }
  func.func @transform_1(%arg0: i32) -> (i32, i32) {
    %c0_i32 = arith.constant 0 : i32
    %c0_i32_0 = arith.constant 0 : i32
    return %arg0, %c0_i32 : i32, i32
  }
  func.func @transform_2(%arg0: i32) -> (i32, i32) {
    %c0_i32 = arith.constant 0 : i32
    %c0_i32_0 = arith.constant 0 : i32
    %c0_i32_1 = arith.constant 0 : i32
    return %c0_i32, %c0_i32_0 : i32, i32
  }
  func.func @transform_3(%arg0: i32) -> (i32, i32) {
    %c0_i32 = arith.constant 0 : i32
    %c0_i32_0 = arith.constant 0 : i32
    %c0_i32_1 = arith.constant 0 : i32
    return %c0_i32, %c0_i32_0 : i32, i32
  }
  func.func @transform_4(%arg0: i32) -> (i32, i32) {
    %c0_i32 = arith.constant 0 : i32
    %c0_i32_0 = arith.constant 0 : i32
    %c0_i32_1 = arith.constant 0 : i32
    return %c0_i32, %c0_i32_0 : i32, i32
  }
  func.func @transform_5(%arg0: i32) -> (i32, i32) {
    %c0_i32 = arith.constant 0 : i32
    %c0_i32_0 = arith.constant 0 : i32
    %c0_i32_1 = arith.constant 0 : i32
    return %c0_i32, %c0_i32_0 : i32, i32
  }
  func.func @transform_6(%arg0: i32) -> (i32, i32) {
    %c0_i32 = arith.constant 0 : i32
    %c0_i32_0 = arith.constant 0 : i32
    %c0_i32_1 = arith.constant 0 : i32
    return %c0_i32, %c0_i32_0 : i32, i32
  }
  func.func @transform_7(%arg0: i32) -> (i32, i32) {
    %c0_i32 = arith.constant 0 : i32
    %c0_i32_0 = arith.constant 0 : i32
    %c0_i32_1 = arith.constant 0 : i32
    return %c0_i32, %c0_i32_0 : i32, i32
  }
  func.func @transform_8(%arg0: i32) -> (i32, i32) {
    %c0_i32 = arith.constant 0 : i32
    %c0_i32_0 = arith.constant 0 : i32
    %c0_i32_1 = arith.constant 0 : i32
    return %c0_i32, %c0_i32_0 : i32, i32
  }
  func.func @transform_9(%arg0: i32) -> (i32, i32) {
    %c0_i32 = arith.constant 0 : i32
    %c0_i32_0 = arith.constant 0 : i32
    %c0_i32_1 = arith.constant 0 : i32
    return %c0_i32, %c0_i32_0 : i32, i32
  }
  func.func @transform_10(%arg0: i32) -> (i32, i32) {
    %c0_i32 = arith.constant 0 : i32
    %c0_i32_0 = arith.constant 0 : i32
    return %arg0, %c0_i32 : i32, i32
  }
  func.func @transform_11(%arg0: i32) -> (i32, i32) {
    %c0_i32 = arith.constant 0 : i32
    %c0_i32_0 = arith.constant 0 : i32
    return %c0_i32, %arg0 : i32, i32
  }
}

</mosaic_0001>

<bundles_post_ra>
// kernel: tpu_custom_call.1
= control target key start
LH: loop header
LB: loop body
LE: loop exit
PB: predicated region body
PF: predicated region fallthrough
CT: control target
= control target key end

     0   :  { %17 = vsyncpa [#allocation3], 0  ;;  %s2448_s0 = inlined_call_operand.hbm [shape: f32[8,24], index: 0, kind: input, shape index: {}]   ;;  %s2449_s1 = inlined_call_operand.hbm [shape: f32[8,8], index: 1, kind: input, shape index: {}]   ;;  %s2450_s2 = inlined_call_operand.hbm [shape: bf16[24,512], index: 2, kind: input, shape index: {}]   ;;  %s2451_s3 = inlined_call_operand.vmem [shape: f32[1,512], index: 3, kind: input, shape index: {}]   ;;  %s2452_s4 = inlined_call_operand.hbm [shape: bf16[512,384], index: 4, kind: input, shape index: {}]   ;;  %s2453_s5 = inlined_call_operand.vmem [shape: bf16[8,384], index: 5, kind: input, shape index: {}]   ;;  %s2454_s6 = inlined_call_operand.vmem [shape: f32[1,384], index: 6, kind: input, shape index: {}]   ;;  %s2455_s7 = inlined_call_operand.hbm [shape: bf16[384,128], index: 7, kind: input, shape index: {}]   ;;  %s2456_s8 = inlined_call_operand.vmem [shape: f32[1,128], index: 8, kind: input, shape index: {}]   ;;  %s2457_s9 = inlined_call_operand.vmem [shape: f32[2,128], index: 9, kind: input, shape index: {}]   ;;  %s2458_s10 = inlined_call_operand.hbm [shape: bf16[8,128], index: 10, kind: output, shape index: {0}]   ;;  %s2459_s11 = inlined_call_operand.hbm [shape: f32[1,8], index: 11, kind: output, shape index: {1}]  }
   0x1   :  { %18 = vsyncpa [#allocation6], 0 }
   0x2   :  { %19 = vsyncpa [#allocation9], 0 }
   0x3   :  { %20 = vsyncpa [#allocation4], 0 }
   0x4   :  { %21 = vsyncpa [#allocation13], 0  ;;  %s2198_s17 = smov [#allocation5]   ;;  %s2199_s19 = smov [#allocation8]  }
   0x5   :  { %s38_s18 = sshll.u32 %s2198_s17, 4  ;;  %s61_s20 = sshll.u32 %s2199_s19, 4  ;;  %s39_s18 = int_to_ptr.vmem [resolvable:$true] %s38_s18  ;;  %s2274_s20 = int_to_ptr.vmem [resolvable:$true] %s61_s20 }
   0x6   :  { %s2034_s23 = scalar_lea.hbm %s2449_s1, 128 }
   0x7   :  { %p2035_p0 = scmp.ne.s32.totalorder %s2449_s1, %s2034_s23  ;;  %p2038_p1 = scmp.lt.u32.totalorder %s2034_s23, %s2449_s1 }
   0x9   :  { %p2040_p2 = pnand %p2038_p1, %p2035_p0 }
   0xb   :  { %2043 = shalt.err (!%p2040_p2)
}
   0xc   :  { %s2044_s28 = scalar_lea.vmem %s39_s18, 128  ;;  %p2049_p4 = scmp.lt.s32.totalorder %s39_s18, %s39_s18 }
   0xd   :  { %p2045_p3 = scmp.ne.s32.totalorder %s39_s18, %s2044_s28  ;;  %p2050_p5 = scmp.lt.s32.totalorder %s2044_s28, %s2044_s28 }
   0xf   :  { %p2051_p6 = por %p2050_p5, %p2049_p4 }
  0x11   :  { %p2052_p7 = pnand %p2051_p6, %p2045_p3 }
  0x13   :  { %2055 = shalt.err (!%p2052_p7)
}
  0x14   :  { %41 = dma.hbm_to_vmem [thread:$0]  %s2449_s1, 128, %s39_s18, [#allocation6]  }
  0x15   :  { %s2056_s14 = scalar_lea.hbm %s2452_s4, 12288 }
  0x16   :  { %p2057_p8 = scmp.ne.s32.totalorder %s2452_s4, %s2056_s14  ;;  %p2060_p9 = scmp.lt.u32.totalorder %s2056_s14, %s2452_s4 }
  0x18   :  { %p2062_p10 = pnand %p2060_p9, %p2057_p8 }
  0x1a   :  { %2065 = shalt.err (!%p2062_p10)
}
  0x1b   :  { %s2066_s21 = scalar_lea.vmem %s2274_s20, 12288  ;;  %p2071_p12 = scmp.lt.s32.totalorder %s2274_s20, %s2274_s20 }
  0x1c   :  { %p2067_p11 = scmp.ne.s32.totalorder %s2274_s20, %s2066_s21  ;;  %p2072_p13 = scmp.lt.s32.totalorder %s2066_s21, %s2066_s21 }
  0x1e   :  { %p2073_p0 = por %p2072_p13, %p2071_p12 }
  0x20   :  { %p2074_p1 = pnand %p2073_p0, %p2067_p11 }
  0x22   :  { %2077 = shalt.err (!%p2074_p1)
}
  0x23   :  { %s2200_s1 = smov 192   ;;  %s2201_s18 = smov 12  }
  0x24   :  { %67 = dma.hbm_to_vmem [thread:$0]  %s2452_s4, 12288, %s2274_s20, [#allocation9], %s2200_s1, %s2200_s1, %s2201_s18  }
  0x25   :  { %s2202_s24 = smov [#allocation2]   ;;  %s2203_s26 = smov [#allocation7]  }
  0x26   :  { %s28_s25 = sshll.u32 %s2202_s24, 4  ;;  %s47_s27 = sshll.u32 %s2203_s26, 4  ;;  %s29_s25 = int_to_ptr.vmem [resolvable:$true] %s28_s25  ;;  %s2305_s27 = int_to_ptr.vmem [resolvable:$true] %s47_s27 }
  0x27   :  { %s2078_s30 = scalar_lea.hbm %s2448_s0, 128 }
  0x28   :  { %p2079_p2 = scmp.ne.s32.totalorder %s2448_s0, %s2078_s30  ;;  %p2082_p3 = scmp.lt.u32.totalorder %s2078_s30, %s2448_s0 }
  0x2a   :  { %p2084_p4 = pnand %p2082_p3, %p2079_p2 }
  0x2c   :  { %2087 = shalt.err (!%p2084_p4)
}
  0x2d   :  { %s2088_s4 = scalar_lea.vmem %s29_s25, 128  ;;  %p2093_p6 = scmp.lt.s32.totalorder %s29_s25, %s29_s25 }
  0x2e   :  { %p2089_p5 = scmp.ne.s32.totalorder %s29_s25, %s2088_s4  ;;  %p2094_p7 = scmp.lt.s32.totalorder %s2088_s4, %s2088_s4 }
  0x30   :  { %p2095_p8 = por %p2094_p7, %p2093_p6 }
  0x32   :  { %p2096_p9 = pnand %p2095_p8, %p2089_p5 }
  0x34   :  { %2099 = shalt.err (!%p2096_p9)
}
  0x35   :  { %31 = dma.hbm_to_vmem [thread:$0]  %s2448_s0, 128, %s29_s25, [#allocation3]  }
  0x36   :  { %s2100_s21 = scalar_lea.hbm %s2450_s2, 768 }
  0x37   :  { %p2101_p10 = scmp.ne.s32.totalorder %s2450_s2, %s2100_s21  ;;  %p2104_p11 = scmp.lt.u32.totalorder %s2100_s21, %s2450_s2 }
  0x39   :  { %p2106_p12 = pnand %p2104_p11, %p2101_p10 }
  0x3b   :  { %2109 = shalt.err (!%p2106_p12)
}
  0x3c   :  { %s2110_s24 = scalar_lea.vmem %s2305_s27, 768  ;;  %p2115_p0 = scmp.lt.s32.totalorder %s2305_s27, %s2305_s27 }
  0x3d   :  { %p2111_p13 = scmp.ne.s32.totalorder %s2305_s27, %s2110_s24  ;;  %p2116_p1 = scmp.lt.s32.totalorder %s2110_s24, %s2110_s24 }
  0x3f   :  { %p2117_p2 = por %p2116_p1, %p2115_p0 }
  0x41   :  { %p2118_p3 = pnand %p2117_p2, %p2111_p13 }
  0x43   :  { %2121 = shalt.err (!%p2118_p3)
}
  0x44   :  { %s2204_s0 = smov 256   ;;  %s2205_s25 = smov 16  }
  0x45   :  { %53 = dma.hbm_to_vmem [thread:$0]  %s2450_s2, 768, %s2305_s27, [#allocation6], %s2204_s0, %s2204_s0, %s2205_s25  }
  0x46   :  { %s2206_s29 = smov [#allocation10]   ;;  %s2122_s14 = scalar_lea.hbm %s2455_s7, 3072 }
  0x47   :  { %s77_s30 = sshll.u32 %s2206_s29, 4  ;;  %p2123_p4 = scmp.ne.s32.totalorder %s2455_s7, %s2122_s14  ;;  %s78_s30 = int_to_ptr.vmem [resolvable:$true] %s77_s30 }
  0x48   :  { %p2126_p5 = scmp.lt.u32.totalorder %s2122_s14, %s2455_s7 }
  0x4a   :  { %p2128_p6 = pnand %p2126_p5, %p2123_p4 }
  0x4c   :  { %2131 = shalt.err (!%p2128_p6)
}
  0x4d   :  { %s2132_s17 = scalar_lea.vmem %s78_s30, 3072  ;;  %p2137_p8 = scmp.lt.s32.totalorder %s78_s30, %s78_s30 }
  0x4e   :  { %p2133_p7 = scmp.ne.s32.totalorder %s78_s30, %s2132_s17  ;;  %p2138_p9 = scmp.lt.s32.totalorder %s2132_s17, %s2132_s17 }
  0x50   :  { %p2139_p10 = por %p2138_p9, %p2137_p8 }
  0x52   :  { %p2140_p11 = pnand %p2139_p10, %p2133_p7 }
  0x54   :  { %2143 = shalt.err (!%p2140_p11)
}
  0x55   :  { %s2207_s2 = smov 64   ;;  %s2208_s27 = smov 4  }
  0x56   :  { %83 = dma.hbm_to_vmem [thread:$0]  %s2455_s7, 3072, %s78_s30, [#allocation9], %s2207_s2, %s2207_s2, %s2208_s27  }
  0x57   :  { %2188 = dma.done.wait [#allocation3], 128  }
  0x58   :  { %2189 = vsyncadd [#allocation3], 4294967168 }
  0x59   :  { %2190 = dma.done.wait [#allocation6], 896  }
  0x5a   :  { %2191 = vsyncadd [#allocation6], 4294966400 }
  0x5b   :  { %2192 = dma.done.wait [#allocation9], 15360  }
  0x5c   :  { %2193 = vsyncadd [#allocation9], 4294951936  ;;  %v2209_v0 = vmov 0   ;;  %v1865_v1 = vld [vmem:[#allocation7 + $0x4] ss:$16 sps:$4 sm:$0xff]   ;;  %vm170_vm0 = vcmask 1043456  }
  0x5d   :  { %215 = vmatprep.mubr.bf16.mxu0 %v2209_v0  ;;  %256 = vmatprep.mubr.bf16.mxu1 %v2209_v0  ;;  %v1867_v2 = vld [vmem:[#allocation7 + $0xc] ss:$16 sps:$4 sm:$0xff]   ;;  %v1869_v3 = vld [vmem:[#allocation7] ss:$16 sps:$4 sm:$0xff]   ;;  %v1870_v4 = vld [vmem:[#allocation7 + $0x8] ss:$16 sps:$4 sm:$0xff]  }
  0x5e   :  { %183 = vmatprep.subr.bf16.mxu0 %v1865_v1  ;;  %v112_v5 = vld [vmem:[#allocation7 + $0x20] sm:$0xff]  ;;  %224 = vmatprep.subr.bf16.mxu1 %v1867_v2  ;;  %v113_v7 = vld [vmem:[#allocation7 + $0x28] sm:$0xff]  ;;  %v104_v12 = vld [vmem:[#allocation2] sm:$0xff]  ;;  %vm166_vm1 = vcmask 195584   ;;  %v2210_v20 = vmov 0.0   ;;  %vm2211_vm2 = vmmov 0  }
  0x5f   :  { %v1605_v6 = vcombine.high %v112_v5, %v112_v5  ;;  %v1604_v8 = vcombine.low %v112_v5, %v112_v5  ;;  %v401_v9 = vld [vmem:[%s2453_s5] sm:$0xff]  ;;  %184 = vmatpush1.bf16.msra.mxu0 %v1869_v3  ;;  %225 = vmatpush1.bf16.msra.mxu1 %v1870_v4  ;;  %v1607_v10 = vcombine.high %v113_v7, %v113_v7  ;;  %v1877_v17 = vld [vmem:[%s2453_s5 + $0x8] ss:$0 sps:$4 sm:$0xff]   ;;  %v106_v24 = vld [vmem:[#allocation5] sm:$0xff]  ;;  %vm411_vm3 = vcmask 64512  }
  0x60   :  { %v1606_v11 = vcombine.low %v113_v7, %v113_v7  ;;  %v1613_v14 = vcombine.high %v401_v9, %v401_v9  ;;  %v1612_v15 = vcombine.low %v401_v9, %v401_v9  ;;  %v105_v18 = vpack.c.bf16 %v104_v12, %v104_v12  ;;  %v1880_v21 = vld [vmem:[#allocation8 + $0x4] ss:$12 sps:$4 sm:$0xff]   ;;  %v1878_v26 = vld [vmem:[#allocation8] ss:$12 sps:$4 sm:$0xff]   ;;  %v1886_v28 = vld [vmem:[#allocation8 + $0x1c] ss:$12 sps:$4 sm:$0xff]  }
  0x61   :  { %1608 = vmatprep.subr.msk.bf16.mxu0 %vm170_vm0, %v1605_v6  ;;  %v172_v13 = vsel %vm170_vm0, %v1604_v8, 0  ;;  %1610 = vmatprep.subr.msk.bf16.mxu1 %vm170_vm0, %v1607_v10  ;;  %v422_v22 = vsel %vm170_vm0, %v1877_v17, 0  ;;  %v1883_v23 = vld [vmem:[#allocation8 + $0x184] ss:$12 sps:$4 sm:$0xff]   ;;  %v107_v25 = vpack.c.bf16 %v106_v24, %v106_v24  ;;  %v1881_v27 = vld [vmem:[#allocation8 + $0x180] ss:$12 sps:$4 sm:$0xff]  }
  0x62   :  { %v178_v16 = vsel %vm170_vm0, %v1606_v11, 0  ;;  %v416_v19 = vsel %vm170_vm0, %v1612_v15, 0  ;;  %v1889_v29 = vld [vmem:[#allocation8 + $0x19c] ss:$12 sps:$4 sm:$0xff]   ;;  %v1884_v30 = vld [vmem:[#allocation8 + $0x18] ss:$12 sps:$4 sm:$0xff]  }
  0x63   :  { %186 = vmatpush1.bf16.msra.mxu0 %v172_v13  ;;  %227 = vmatpush1.bf16.msra.mxu1 %v178_v16  ;;  %v1887_v31 = vld [vmem:[#allocation8 + $0x198] ss:$12 sps:$4 sm:$0xff]   ;;  %v1892_v32 = vld [vmem:[#allocation8 + $0x34] ss:$12 sps:$4 sm:$0xff]   ;;  %v1890_v34 = vld [vmem:[#allocation8 + $0x30] ss:$12 sps:$4 sm:$0xff]  }
  0x64   :  { %1615 = vmatprep.subr.msk.bf16.mxu0 %vm170_vm0, %v1613_v14  ;;  %1818 = vmatprep.subr.bf16.mxu1 %v2210_v20  ;;  %v1895_v33 = vld [vmem:[#allocation8 + $0x1b4] ss:$12 sps:$4 sm:$0xff]   ;;  %v1893_v35 = vld [vmem:[#allocation8 + $0x1b0] ss:$12 sps:$4 sm:$0xff]   ;;  %v1898_v36 = vld [vmem:[#allocation8 + $0x4c] ss:$12 sps:$4 sm:$0xff]  }
  0x65   :  { %v1901_v37 = vld [vmem:[#allocation8 + $0x1cc] ss:$12 sps:$4 sm:$0xff]   ;;  %v1896_v38 = vld [vmem:[#allocation8 + $0x48] ss:$12 sps:$4 sm:$0xff]   ;;  %v1904_v40 = vld [vmem:[#allocation8 + $0x64] ss:$12 sps:$4 sm:$0xff]  }
  0x66   :  { %1609 = vmatmul.mubr.msk.bf16.vlgmr.msra.gmra.mrb[0].mxu0 %vm166_vm1, %v105_v18  ;;  %1611 = vmatmul.mubr.msk.bf16.vlgmr.msra.gmra.mrb[0].mxu1 %vm166_vm1, %v105_v18  ;;  %v1899_v39 = vld [vmem:[#allocation8 + $0x1c8] ss:$12 sps:$4 sm:$0xff]   ;;  %v1907_v41 = vld [vmem:[#allocation8 + $0x1e4] ss:$12 sps:$4 sm:$0xff]   ;;  %v1902_v42 = vld [vmem:[#allocation8 + $0x60] ss:$12 sps:$4 sm:$0xff]  }
  0x67   :  { %425 = vmatpush1.bf16.msra.mxu0 %v416_v19  ;;  %456 = vmatprep.mubr.bf16.mxu0 %v2209_v0  ;;  %v1905_v43 = vld [vmem:[#allocation8 + $0x1e0] ss:$12 sps:$4 sm:$0xff]   ;;  %v1910_v44 = vld [vmem:[#allocation8 + $0x7c] ss:$12 sps:$4 sm:$0xff]   ;;  %v1908_v46 = vld [vmem:[#allocation8 + $0x78] ss:$12 sps:$4 sm:$0xff]  }
  0x68   :  { %1819 = vmatpush3.bf16.msra.mxu1 %v422_v22  ;;  %1820 = vmatprep.mubr.msk.bf16.mxu1 %vm2211_vm2, %v2210_v20  ;;  %v1913_v45 = vld [vmem:[#allocation8 + $0x1fc] ss:$12 sps:$4 sm:$0xff]   ;;  %v1911_v47 = vld [vmem:[#allocation8 + $0x1f8] ss:$12 sps:$4 sm:$0xff]   ;;  %v1916_v48 = vld [vmem:[#allocation8 + $0x94] ss:$12 sps:$4 sm:$0xff]  }
  0x69   :  { %1017 = vmatprep.subr.bf16.mxu0 %v1880_v21  ;;  %1058 = vmatprep.subr.bf16.mxu1 %v1883_v23  ;;  %v1919_v49 = vld [vmem:[#allocation8 + $0x214] ss:$12 sps:$4 sm:$0xff]   ;;  %v1914_v50 = vld [vmem:[#allocation8 + $0x90] ss:$12 sps:$4 sm:$0xff]   ;;  %v1922_v52 = vld [vmem:[#allocation8 + $0xac] ss:$12 sps:$4 sm:$0xff]  }
  0x6a   :  { %v1917_v51 = vld [vmem:[#allocation8 + $0x210] ss:$12 sps:$4 sm:$0xff]   ;;  %v1925_v53 = vld [vmem:[#allocation8 + $0x22c] ss:$12 sps:$4 sm:$0xff]   ;;  %v1920_v54 = vld [vmem:[#allocation8 + $0xa8] ss:$12 sps:$4 sm:$0xff]  }
  0x6b   :  { %v1923_v55 = vld [vmem:[#allocation8 + $0x228] ss:$12 sps:$4 sm:$0xff]   ;;  %v1928_v56 = vld [vmem:[#allocation8 + $0xc4] ss:$12 sps:$4 sm:$0xff]   ;;  %v1926_v58 = vld [vmem:[#allocation8 + $0xc0] ss:$12 sps:$4 sm:$0xff]  }
  0x6c   :  { %v1931_v57 = vld [vmem:[#allocation8 + $0x244] ss:$12 sps:$4 sm:$0xff]   ;;  %v1929_v59 = vld [vmem:[#allocation8 + $0x240] ss:$12 sps:$4 sm:$0xff]   ;;  %v1934_v60 = vld [vmem:[#allocation8 + $0xdc] ss:$12 sps:$4 sm:$0xff]  }
  0x6d   :  { %v1937_v61 = vld [vmem:[#allocation8 + $0x25c] ss:$12 sps:$4 sm:$0xff]   ;;  %v1932_v62 = vld [vmem:[#allocation8 + $0xd8] ss:$12 sps:$4 sm:$0xff]   ;;  %v1940_v0 = vld [vmem:[#allocation8 + $0xf4] ss:$12 sps:$4 sm:$0xff]  }
  0x6e   :  { %1616 = vmatmul.mubr.msk.bf16.vlgmr.msra.gmra.mrb[4].mxu0 %vm411_vm3, %v107_v25  ;;  %1821 = vmatmul.mubr.msk.bf16.vlgmr.msra.gmra.mrb[4].mxu1 %vm411_vm3, %v107_v25  ;;  %v1935_v63 = vld [vmem:[#allocation8 + $0x258] ss:$12 sps:$4 sm:$0xff]   ;;  %v1943_v1 = vld [vmem:[#allocation8 + $0x274] ss:$12 sps:$4 sm:$0xff]   ;;  %v1938_v2 = vld [vmem:[#allocation8 + $0xf0] ss:$12 sps:$4 sm:$0xff]  }
  0x6f   :  { %1018 = vmatpush1.bf16.msra.mxu0 %v1878_v26  ;;  %1059 = vmatpush1.bf16.msra.mxu1 %v1881_v27  ;;  %v1941_v3 = vld [vmem:[#allocation8 + $0x270] ss:$12 sps:$4 sm:$0xff]   ;;  %v1946_v4 = vld [vmem:[#allocation8 + $0x10c] ss:$12 sps:$4 sm:$0xff]   ;;  %v1944_v6 = vld [vmem:[#allocation8 + $0x108] ss:$12 sps:$4 sm:$0xff]   ;;  %v116_v27 = vlaneseq }
  0x70   :  { %1019 = vmatprep.subr.bf16.mxu0 %v1886_v28  ;;  %1060 = vmatprep.subr.bf16.mxu1 %v1889_v29  ;;  %v1949_v5 = vld [vmem:[#allocation8 + $0x28c] ss:$12 sps:$4 sm:$0xff]   ;;  %v1947_v7 = vld [vmem:[#allocation8 + $0x288] ss:$12 sps:$4 sm:$0xff]   ;;  %v1952_v8 = vld [vmem:[#allocation8 + $0x124] ss:$12 sps:$4 sm:$0xff]  }
  0x71   :  { %v1955_v9 = vld [vmem:[#allocation8 + $0x2a4] ss:$12 sps:$4 sm:$0xff]   ;;  %v1950_v10 = vld [vmem:[#allocation8 + $0x120] ss:$12 sps:$4 sm:$0xff]   ;;  %v1958_v12 = vld [vmem:[#allocation8 + $0x13c] ss:$12 sps:$4 sm:$0xff]  }
  0x72   :  { %v1953_v11 = vld [vmem:[#allocation8 + $0x2a0] ss:$12 sps:$4 sm:$0xff]   ;;  %v1961_v13 = vld [vmem:[#allocation8 + $0x2bc] ss:$12 sps:$4 sm:$0xff]   ;;  %v1956_v14 = vld [vmem:[#allocation8 + $0x138] ss:$12 sps:$4 sm:$0xff]  }
  0x73   :  { %1020 = vmatpush1.bf16.msra.mxu0 %v1884_v30  ;;  %1061 = vmatpush1.bf16.msra.mxu1 %v1887_v31  ;;  %v1959_v15 = vld [vmem:[#allocation8 + $0x2b8] ss:$12 sps:$4 sm:$0xff]   ;;  %v1964_v16 = vld [vmem:[#allocation8 + $0x154] ss:$12 sps:$4 sm:$0xff]   ;;  %v1962_v18 = vld [vmem:[#allocation8 + $0x150] ss:$12 sps:$4 sm:$0xff]  }
  0x74   :  { %1021 = vmatprep.subr.bf16.mxu0 %v1892_v32  ;;  %1062 = vmatprep.subr.bf16.mxu1 %v1895_v33  ;;  %v1967_v17 = vld [vmem:[#allocation8 + $0x2d4] ss:$12 sps:$4 sm:$0xff]   ;;  %v1965_v19 = vld [vmem:[#allocation8 + $0x2d0] ss:$12 sps:$4 sm:$0xff]   ;;  %v1970_v21 = vld [vmem:[#allocation8 + $0x16c] ss:$12 sps:$4 sm:$0xff]  }
  0x75   :  { %v1973_v22 = vld [vmem:[#allocation8 + $0x2ec] ss:$12 sps:$4 sm:$0xff]   ;;  %v1968_v23 = vld [vmem:[#allocation8 + $0x168] ss:$12 sps:$4 sm:$0xff]   ;;  %v2364_v28 = vshrl.u32 %v116_v27, 7 }
  0x76   :  { %v1971_v24 = vld [vmem:[#allocation8 + $0x2e8] ss:$12 sps:$4 sm:$0xff]   ;;  %v114_v31 = vld [vmem:[%s2451_s3] sm:$0xf]  ;;  %v2000_v27 = vld [vmem:[#allocation8 + $0x98] ss:$12 sps:$4 sm:$0xff]  }
  0x77   :  { %1022 = vmatpush1.bf16.msra.mxu0 %v1890_v34  ;;  %1063 = vmatpush1.bf16.msra.mxu1 %v1893_v35  ;;  %v1974_v25 = vld [vmem:[#allocation8 + $0xc8] ss:$12 sps:$4 sm:$0xff]   ;;  %v118_v29 = vsub.s32 0, %v2364_v28  ;;  %v126_v30 = vsub.s32 2, %v2364_v28  ;;  %v122_v32 = vsub.s32 1, %v2364_v28  ;;  %v130_v33 = vsub.s32 3, %v2364_v28 }
  0x78   :  { %1023 = vmatprep.subr.bf16.mxu0 %v1898_v36  ;;  %1064 = vmatprep.subr.bf16.mxu1 %v1901_v37  ;;  %v1975_v26 = vld [vmem:[#allocation8 + $0x248] ss:$12 sps:$4 sm:$0xff]  }
  0x79   :  { %v119_v34 = vrot.slane %v114_v31, %v118_v29  ;;  %v127_v35 = vrot.slane %v114_v31, %v126_v30  ;;  %v123_v36 = vrot.slane %v114_v31, %v122_v32  ;;  %v131_v37 = vrot.slane %v114_v31, %v130_v33  ;;  %v2001_v31 = vld [vmem:[#allocation8 + $0x218] ss:$12 sps:$4 sm:$0xff]   ;;  %v2002_v33 = vld [vmem:[#allocation8 + $0x170] ss:$12 sps:$4 sm:$0xff]  }
  0x7b   :  { %1024 = vmatpush1.bf16.msra.mxu0 %v1896_v38  ;;  %1065 = vmatpush1.bf16.msra.mxu1 %v1899_v39 }
  0x7c   :  { %1025 = vmatprep.subr.bf16.mxu0 %v1904_v40  ;;  %1066 = vmatprep.subr.bf16.mxu1 %v1907_v41 }
  0x7f   :  { %1026 = vmatpush1.bf16.msra.mxu0 %v1902_v42  ;;  %1067 = vmatpush1.bf16.msra.mxu1 %v1905_v43 }
  0x80   :  { %1027 = vmatprep.subr.bf16.mxu0 %v1910_v44  ;;  %1068 = vmatprep.subr.bf16.mxu1 %v1913_v45 }
  0x83   :  { %1028 = vmatpush1.bf16.msra.mxu0 %v1908_v46  ;;  %1069 = vmatpush1.bf16.msra.mxu1 %v1911_v47 }
  0x84   :  { %1029 = vmatprep.subr.bf16.mxu0 %v1916_v48  ;;  %1070 = vmatprep.subr.bf16.mxu1 %v1919_v49 }
  0x87   :  { %1030 = vmatpush1.bf16.msra.mxu0 %v1914_v50  ;;  %1071 = vmatpush1.bf16.msra.mxu1 %v1917_v51 }
  0x88   :  { %1031 = vmatprep.subr.bf16.mxu0 %v1922_v52  ;;  %1072 = vmatprep.subr.bf16.mxu1 %v1925_v53 }
  0x8b   :  { %1032 = vmatpush1.bf16.msra.mxu0 %v1920_v54  ;;  %1073 = vmatpush1.bf16.msra.mxu1 %v1923_v55 }
  0x8c   :  { %1033 = vmatprep.subr.bf16.mxu0 %v1928_v56  ;;  %1074 = vmatprep.subr.bf16.mxu1 %v1931_v57  ;;  %v1976_v57 = vld [vmem:[#allocation8 + $0x8] ss:$12 sps:$4 sm:$0xff]  }
  0x8f   :  { %1034 = vmatpush1.bf16.msra.mxu0 %v1926_v58  ;;  %1075 = vmatpush1.bf16.msra.mxu1 %v1929_v59  ;;  %v1977_v58 = vld [vmem:[#allocation8 + $0x188] ss:$12 sps:$4 sm:$0xff]  }
  0x90   :  { %1035 = vmatprep.subr.bf16.mxu0 %v1934_v60  ;;  %1076 = vmatprep.subr.bf16.mxu1 %v1937_v61  ;;  %v1978_v60 = vld [vmem:[#allocation8 + $0xe0] ss:$12 sps:$4 sm:$0xff]  }
  0x91   :  { %v1979_v61 = vld [vmem:[#allocation8 + $0x260] ss:$12 sps:$4 sm:$0xff]  }
  0x93   :  { %1036 = vmatpush1.bf16.msra.mxu0 %v1932_v62  ;;  %1077 = vmatpush1.bf16.msra.mxu1 %v1935_v63 }
  0x94   :  { %1037 = vmatprep.subr.bf16.mxu0 %v1940_v0  ;;  %1078 = vmatprep.subr.bf16.mxu1 %v1943_v1 }
  0x97   :  { %1038 = vmatpush1.bf16.msra.mxu0 %v1938_v2  ;;  %1079 = vmatpush1.bf16.msra.mxu1 %v1941_v3  ;;  %v1980_v2 = vld [vmem:[#allocation8 + $0x20] ss:$12 sps:$4 sm:$0xff]  }
  0x98   :  { %1039 = vmatprep.subr.bf16.mxu0 %v1946_v4  ;;  %1080 = vmatprep.subr.bf16.mxu1 %v1949_v5  ;;  %v1981_v3 = vld [vmem:[#allocation8 + $0x1a0] ss:$12 sps:$4 sm:$0xff]  }
  0x9b   :  { %1040 = vmatpush1.bf16.msra.mxu0 %v1944_v6  ;;  %1081 = vmatpush1.bf16.msra.mxu1 %v1947_v7  ;;  %v1982_v6 = vld [vmem:[#allocation8 + $0xf8] ss:$12 sps:$4 sm:$0xff]  }
  0x9c   :  { %1041 = vmatprep.subr.bf16.mxu0 %v1952_v8  ;;  %1082 = vmatprep.subr.bf16.mxu1 %v1955_v9  ;;  %v1983_v7 = vld [vmem:[#allocation8 + $0x278] ss:$12 sps:$4 sm:$0xff]  }
  0x9f   :  { %1042 = vmatpush1.bf16.msra.mxu0 %v1950_v10  ;;  %1083 = vmatpush1.bf16.msra.mxu1 %v1953_v11  ;;  %v1984_v10 = vld [vmem:[#allocation8 + $0x38] ss:$12 sps:$4 sm:$0xff]  }
  0xa0   :  { %1043 = vmatprep.subr.bf16.mxu0 %v1958_v12  ;;  %1084 = vmatprep.subr.bf16.mxu1 %v1961_v13  ;;  %v1985_v11 = vld [vmem:[#allocation8 + $0x1b8] ss:$12 sps:$4 sm:$0xff]   ;;  %v1986_v12 = vld [vmem:[#allocation8 + $0x110] ss:$12 sps:$4 sm:$0xff]  }
  0xa1   :  { %v1987_v13 = vld [vmem:[#allocation8 + $0x290] ss:$12 sps:$4 sm:$0xff]  }
  0xa3   :  { %1044 = vmatpush1.bf16.msra.mxu0 %v1956_v14  ;;  %1085 = vmatpush1.bf16.msra.mxu1 %v1959_v15  ;;  %v1988_v14 = vld [vmem:[#allocation8 + $0x50] ss:$12 sps:$4 sm:$0xff]  }
  0xa4   :  { %1045 = vmatprep.subr.bf16.mxu0 %v1964_v16  ;;  %1086 = vmatprep.subr.bf16.mxu1 %v1967_v17  ;;  %v1989_v15 = vld [vmem:[#allocation8 + $0x1d0] ss:$12 sps:$4 sm:$0xff]   ;;  %v1990_v16 = vld [vmem:[#allocation8 + $0x128] ss:$12 sps:$4 sm:$0xff]  }
  0xa5   :  { %v1991_v17 = vld [vmem:[#allocation8 + $0x2a8] ss:$12 sps:$4 sm:$0xff]  }
  0xa7   :  { %1046 = vmatpush1.bf16.msra.mxu0 %v1962_v18  ;;  %1087 = vmatpush1.bf16.msra.mxu1 %v1965_v19  ;;  %v1992_v18 = vld [vmem:[#allocation8 + $0x68] ss:$12 sps:$4 sm:$0xff]  }
  0xa8   :  { %1047 = vmatprep.subr.bf16.mxu0 %v1970_v21  ;;  %1088 = vmatprep.subr.bf16.mxu1 %v1973_v22  ;;  %v1993_v19 = vld [vmem:[#allocation8 + $0x1e8] ss:$12 sps:$4 sm:$0xff]   ;;  %v1994_v21 = vld [vmem:[#allocation8 + $0x140] ss:$12 sps:$4 sm:$0xff]  }
  0xa9   :  { %v1995_v22 = vld [vmem:[#allocation8 + $0x2c0] ss:$12 sps:$4 sm:$0xff]  }
  0xab   :  { %1048 = vmatpush1.bf16.msra.mxu0 %v1968_v23  ;;  %1089 = vmatpush1.bf16.msra.mxu1 %v1971_v24  ;;  %v1996_v23 = vld [vmem:[#allocation8 + $0x80] ss:$12 sps:$4 sm:$0xff]  }
  0xac   :  { %1741 = vmatprep.subr.bf16.mxu0 %v1974_v25  ;;  %1763 = vmatprep.subr.bf16.mxu1 %v1975_v26  ;;  %v1997_v24 = vld [vmem:[#allocation8 + $0x200] ss:$12 sps:$4 sm:$0xff]   ;;  %v1998_v25 = vld [vmem:[#allocation8 + $0x158] ss:$12 sps:$4 sm:$0xff]  }
  0xad   :  { %v1999_v26 = vld [vmem:[#allocation8 + $0x2d8] ss:$12 sps:$4 sm:$0xff]  }
 0x139   :  { %v217_v38 = vpop.f32.mrb[0].mxu0  ;;  %v258_v39 = vpop.f32.mrb[0].mxu1 }
 0x13a   :  { %v218_v40 = vadd.f32 %v217_v38, %v119_v34  ;;  %v259_v41 = vadd.f32 %v258_v39, %v127_v35  ;;  %v219_v42 = vpop.f32.mrb[1].mxu0  ;;  %v260_v43 = vpop.f32.mrb[1].mxu1  ;;  %v2003_v34 = vld [vmem:[#allocation8 + $0x2f0] ss:$12 sps:$4 sm:$0xff]   ;;  %v2007_v38 = vld [vmem:[#allocation10] sm:$0xff]   ;;  %v2008_v39 = vld [vmem:[#allocation10 + $0x48] sm:$0xff]  }
 0x13b   :  { %v220_v44 = vadd.f32 %v219_v42, %v123_v36  ;;  %v261_v45 = vadd.f32 %v260_v43, %v131_v37  ;;  %v221_v46 = vpop.f32.mrb[2].mxu0  ;;  %v262_v47 = vpop.f32.mrb[2].mxu1  ;;  %v2004_v35 = vld [vmem:[#allocation8 + $0xb0] ss:$12 sps:$4 sm:$0xff]   ;;  %v2006_v37 = vld [vmem:[#allocation10 + $0x40] sm:$0xff]  }
 0x13c   :  { %v265_v48 = vmax.f32 %v218_v40, 0.0  ;;  %v267_v49 = vmax.f32 %v259_v41, 0.0  ;;  %v222_v50 = vpop.f32.mrb[3].mxu0  ;;  %v263_v51 = vpop.f32.mrb[3].mxu1  ;;  %v2005_v36 = vld [vmem:[#allocation8 + $0x230] ss:$12 sps:$4 sm:$0xff]  }
 0x13d   :  { %v266_v52 = vmax.f32 %v220_v44, 0.0  ;;  %v268_v53 = vmax.f32 %v261_v45, 0.0  ;;  %v2009_v40 = vld [vmem:[#allocation10 + $0x8] sm:$0xff]   ;;  %v2010_v41 = vld [vmem:[#allocation10 + $0x50] sm:$0xff]   ;;  %v2012_v43 = vld [vmem:[#allocation10 + $0x58] sm:$0xff]  }
 0x13e   :  { %v2379_v54 = vpack.c.bf16 %v267_v49, %v267_v49  ;;  %v2381_v59 = vpack.c.bf16 %v265_v48, %v265_v48  ;;  %v2011_v42 = vld [vmem:[#allocation10 + $0x10] sm:$0xff]   ;;  %v2013_v44 = vld [vmem:[#allocation10 + $0x18] sm:$0xff]   ;;  %v2014_v45 = vld [vmem:[#allocation10 + $0x60] sm:$0xff]  }
 0x13f   :  { %v270_v55 = vpack.c.bf16 %v266_v52, %v266_v52  ;;  %v272_v56 = vpack.c.bf16 %v268_v53, %v268_v53  ;;  %v2015_v46 = vld [vmem:[#allocation10 + $0x20] sm:$0xff]   ;;  %v2016_v47 = vld [vmem:[#allocation10 + $0x68] sm:$0xff]   ;;  %v2018_v49 = vld [vmem:[#allocation10 + $0x70] sm:$0xff]  }
 0x140   :  { %v2017_v48 = vld [vmem:[#allocation10 + $0x28] sm:$0xff]   ;;  %v2019_v50 = vld [vmem:[#allocation10 + $0x30] sm:$0xff]   ;;  %v2020_v51 = vld [vmem:[#allocation10 + $0x78] sm:$0xff]  }
 0x141   :  { %1049 = vmatprep.mubr.bf16.mxu0 %v270_v55  ;;  %1090 = vmatprep.mubr.bf16.mxu1 %v272_v56  ;;  %v2383_v62 = vpop.f32.mrb[4].mxu0  ;;  %v2385_v63 = vpop.f32.mrb[4].mxu1  ;;  %v2021_v52 = vld [vmem:[#allocation10 + $0x38] sm:$0xff]   ;;  %v2022_v53 = vld [vmem:[#allocation10 + $0x80] sm:$0xff]  }
 0x142   :  { %1050 = vmatmul.mubr.bf16.vlgmr.msra.gmra.mrb[8].mxu0 %v2381_v59  ;;  %1091 = vmatmul.mubr.bf16.vlgmr.msra.gmra.mrb[8].mxu1 %v2379_v54  ;;  %v2389_v0 = vpop.f32.mrb[5].mxu0  ;;  %v1822_v1 = vpop.f32.mrb[5].mxu1 }
 0x143   :  { %1742 = vmatpush3.bf16.msra.mxu0 %v1976_v57  ;;  %1764 = vmatpush3.bf16.msra.mxu1 %v1977_v58  ;;  %v462_v4 = vpop.f32.mrb[6].mxu0  ;;  %v502_v5 = vpop.f32.mrb[6].mxu1  ;;  %v2026_v57 = vld [vmem:[#allocation10 + $0xa0] sm:$0xff]   ;;  %v2027_v58 = vld [vmem:[#allocation10 + $0xa8] sm:$0xff]  }
 0x144   :  { %1131 = vmatprep.mubr.bf16.mxu0 %v270_v55  ;;  %1171 = vmatprep.mubr.bf16.mxu1 %v272_v56  ;;  %v463_v8 = vpop.f32.mrb[7].mxu0  ;;  %v1823_v9 = vpop.f32.mrb[7].mxu1  ;;  %v2024_v55 = vld [vmem:[#allocation10 + $0x90] sm:$0xff]   ;;  %v2025_v56 = vld [vmem:[#allocation10 + $0x98] sm:$0xff]  }
 0x145   :  { %1743 = vmatprep.subr.bf16.mxu0 %v1978_v60  ;;  %1765 = vmatprep.subr.bf16.mxu1 %v1979_v61  ;;  %v2029_v60 = vld [vmem:[#allocation10 + $0xb8] sm:$0xff]   ;;  %v1179_v61 = vld [vmem:[%s2454_s6] sm:$0x7] }
 0x146   :  { %v1184_v4 = vrot.slane %v1179_v61, %v118_v29  ;;  %v1188_v8 = vrot.slane %v1179_v61, %v122_v32 }
 0x147   :  { %1744 = vmatpush3.bf16.msra.mxu0 %v1980_v2  ;;  %1766 = vmatpush3.bf16.msra.mxu1 %v1981_v3 }
 0x148   :  { %1745 = vmatprep.subr.bf16.mxu0 %v1982_v6  ;;  %1767 = vmatprep.subr.bf16.mxu1 %v1983_v7 }
 0x14b   :  { %1746 = vmatpush3.bf16.msra.mxu0 %v1984_v10  ;;  %1768 = vmatpush3.bf16.msra.mxu1 %v1985_v11 }
 0x14c   :  { %1747 = vmatprep.subr.bf16.mxu0 %v1986_v12  ;;  %1769 = vmatprep.subr.bf16.mxu1 %v1987_v13 }
 0x14f   :  { %1748 = vmatpush3.bf16.msra.mxu0 %v1988_v14  ;;  %1770 = vmatpush3.bf16.msra.mxu1 %v1989_v15 }
 0x150   :  { %1749 = vmatprep.subr.bf16.mxu0 %v1990_v16  ;;  %1771 = vmatprep.subr.bf16.mxu1 %v1991_v17 }
 0x153   :  { %1750 = vmatpush3.bf16.msra.mxu0 %v1992_v18  ;;  %1772 = vmatpush3.bf16.msra.mxu1 %v1993_v19 }
 0x154   :  { %1751 = vmatprep.subr.bf16.mxu0 %v1994_v21  ;;  %1773 = vmatprep.subr.bf16.mxu1 %v1995_v22 }
 0x157   :  { %1752 = vmatpush3.bf16.msra.mxu0 %v1996_v23  ;;  %1774 = vmatpush3.bf16.msra.mxu1 %v1997_v24 }
 0x158   :  { %1753 = vmatprep.subr.bf16.mxu0 %v1998_v25  ;;  %1775 = vmatprep.subr.bf16.mxu1 %v1999_v26 }
 0x15b   :  { %1754 = vmatpush3.bf16.msra.mxu0 %v2000_v27  ;;  %1776 = vmatpush3.bf16.msra.mxu1 %v2001_v31 }
 0x15c   :  { %1755 = vmatprep.subr.bf16.mxu0 %v2002_v33  ;;  %1777 = vmatprep.subr.bf16.mxu1 %v2003_v34  ;;  %v1192_v33 = vrot.slane %v1179_v61, %v126_v30 }
 0x15f   :  { %1756 = vmatpush3.bf16.msra.mxu0 %v2004_v35  ;;  %1778 = vmatpush3.bf16.msra.mxu1 %v2005_v36 }
 0x160   :  { %1785 = vmatprep.subr.bf16.mxu0 %v2006_v37  ;;  %1824 = vmatprep.subr.bf16.mxu1 %v2210_v20 }
 0x162   :  { %1132 = vmatmul.mubr.bf16.vlgmr.msra.gmra.mrb[12].mxu0 %v2381_v59  ;;  %1172 = vmatmul.mubr.bf16.vlgmr.msra.gmra.mrb[12].mxu1 %v2379_v54  ;;  %v2023_v54 = vld [vmem:[#allocation10 + $0x88] sm:$0xff]   ;;  %v2028_v59 = vld [vmem:[#allocation10 + $0xb0] sm:$0xff]  }
 0x163   :  { %1786 = vmatpush3.bf16.msra.mxu0 %v2007_v38  ;;  %1840 = vmatprep.mubr.msk.bf16.mxu1 %vm2211_vm2, %v2210_v20 }
 0x164   :  { %1787 = vmatprep.subr.bf16.mxu0 %v2008_v39  ;;  %1825 = vmatpush3.bf16.msra.mxu1 %v2022_v53 }
 0x165   :  { %1826 = vmatprep.subr.bf16.mxu1 %v2210_v20 }
 0x167   :  { %1788 = vmatpush3.bf16.msra.mxu0 %v2009_v40 }
 0x168   :  { %1789 = vmatprep.subr.bf16.mxu0 %v2010_v41  ;;  %1827 = vmatpush3.bf16.msra.mxu1 %v2023_v54 }
 0x169   :  { %1828 = vmatprep.subr.bf16.mxu1 %v2210_v20 }
 0x16b   :  { %1790 = vmatpush3.bf16.msra.mxu0 %v2011_v42  ;;  %v1714_v42 = vld [vmem:[%s2456_s8] ss:$0 sm:$0xff]  ;;  %s2212_s8 = smov [#allocation11]  }
 0x16c   :  { %1791 = vmatprep.subr.bf16.mxu0 %v2012_v43  ;;  %1829 = vmatpush3.bf16.msra.mxu1 %v2024_v55  ;;  %s1575_s28 = sshll.u32 %s2212_s8, 4  ;;  %s1576_s28 = int_to_ptr.vmem [resolvable:$true] %s1575_s28 }
 0x16d   :  { %1830 = vmatprep.subr.bf16.mxu1 %v2210_v20  ;;  %s2144_s29 = scalar_lea.vmem %s1576_s28, 64  ;;  %p2149_p13 = scmp.lt.s32.totalorder %s1576_s28, %s1576_s28 }
 0x16e   :  { %p2145_p12 = scmp.ne.s32.totalorder %s1576_s28, %s2144_s29  ;;  %p2150_p0 = scmp.lt.s32.totalorder %s2144_s29, %s2144_s29 }
 0x16f   :  { %1792 = vmatpush3.bf16.msra.mxu0 %v2013_v44 }
 0x170   :  { %1793 = vmatprep.subr.bf16.mxu0 %v2014_v45  ;;  %1831 = vmatpush3.bf16.msra.mxu1 %v2025_v56  ;;  %p2151_p1 = por %p2150_p0, %p2149_p13 }
 0x171   :  { %1832 = vmatprep.subr.bf16.mxu1 %v2210_v20 }
 0x172   :  { %p2152_p2 = pnand %p2151_p1, %p2145_p12 }
 0x173   :  { %1794 = vmatpush3.bf16.msra.mxu0 %v2015_v46 }
 0x174   :  { %1795 = vmatprep.subr.bf16.mxu0 %v2016_v47  ;;  %1833 = vmatpush3.bf16.msra.mxu1 %v2026_v57 }
 0x175   :  { %1834 = vmatprep.subr.bf16.mxu1 %v2210_v20 }
 0x177   :  { %1796 = vmatpush3.bf16.msra.mxu0 %v2017_v48 }
 0x178   :  { %1797 = vmatprep.subr.bf16.mxu0 %v2018_v49  ;;  %1835 = vmatpush3.bf16.msra.mxu1 %v2027_v58 }
 0x179   :  { %1836 = vmatprep.subr.bf16.mxu1 %v2210_v20 }
 0x17b   :  { %1798 = vmatpush3.bf16.msra.mxu0 %v2019_v50 }
 0x17c   :  { %1799 = vmatprep.subr.bf16.mxu0 %v2020_v51  ;;  %1837 = vmatpush3.bf16.msra.mxu1 %v2028_v59  ;;  %v1491_v51 = vld [vmem:[%s2457_s9] sm:$0x3] }
 0x17d   :  { %1838 = vmatprep.subr.bf16.mxu1 %v2210_v20 }
 0x17f   :  { %1800 = vmatpush3.bf16.msra.mxu0 %v2021_v52 }
 0x180   :  { %1844 = vmatprep.subr.mxu0 %v2210_v20  ;;  %1839 = vmatpush3.bf16.msra.mxu1 %v2029_v60 }
 0x215   :  { %v1051_v1 = vpop.f32.mrb[8].mxu0  ;;  %v1092_v2 = vpop.f32.mrb[8].mxu1 }
 0x216   :  { %v1052_v3 = vadd.f32 %v1051_v1, %v2383_v62  ;;  %v1053_v5 = vpop.f32.mrb[9].mxu0  ;;  %v1094_v6 = vpop.f32.mrb[9].mxu1 }
 0x217   :  { %v1054_v7 = vadd.f32 %v1053_v5, %v2389_v0  ;;  %v1055_v9 = vpop.f32.mrb[10].mxu0  ;;  %v1096_v10 = vpop.f32.mrb[10].mxu1 }
 0x218   :  { %v1093_v11 = vadd.f32 %v1092_v2, %v1052_v3  ;;  %v1056_v12 = vpop.f32.mrb[11].mxu0  ;;  %v1097_v13 = vpop.f32.mrb[11].mxu1 }
 0x219   :  { %v1095_v14 = vadd.f32 %v1094_v6, %v1054_v7 }
 0x21a   :  { %v1196_v15 = vadd.f32 %v1184_v4, %v1093_v11 }
 0x21b   :  { %v1197_v16 = vadd.f32 %v1188_v8, %v1095_v14 }
 0x21c   :  { %v1199_v17 = vmax.f32 %v1196_v15, 0.0 }
 0x21d   :  { %v1200_v62 = vmax.f32 %v1197_v16, 0.0 }
 0x21e   :  { %v1202_v19 = vpack.c.bf16 %v1199_v17, %v1199_v17 }
 0x21f   :  { %v1203_v18 = vpack.c.bf16 %v1200_v62, %v1200_v62 }
 0x221   :  { %1436 = vmatprep.mubr.bf16.mxu0 %v1203_v18 }
 0x222   :  { %1437 = vmatmul.mubr.bf16.vlgmr.msra.gmra.mrb[16].mxu0 %v1202_v19 }
 0x223   :  { %1846 = vmatprep.mubr.msk.f32.mxu0 %vm2211_vm2, %v2210_v20 }
 0x235   :  { %v1757_v29 = vpop.f32.mrb[12].mxu0  ;;  %v1779_v0 = vpop.f32.mrb[12].mxu1 }
 0x236   :  { %v1758_v32 = vpop.f32.mrb[13].mxu0  ;;  %v1780_v21 = vpop.f32.mrb[13].mxu1 }
 0x237   :  { %v1759_v22 = vadd.f32 %v1758_v32, %v1757_v29  ;;  %v1781_v23 = vadd.f32 %v1780_v21, %v1779_v0  ;;  %v1760_v24 = vpop.f32.mrb[14].mxu0  ;;  %v1782_v25 = vpop.f32.mrb[14].mxu1 }
 0x238   :  { %v1761_v26 = vpop.f32.mrb[15].mxu0  ;;  %v1783_v27 = vpop.f32.mrb[15].mxu1 }
 0x239   :  { %v1134_v31 = vadd.f32 %v1759_v22, %v2385_v63 }
 0x23b   :  { %v1174_v34 = vadd.f32 %v1781_v23, %v1134_v31 }
 0x23d   :  { %v1198_v35 = vadd.f32 %v1192_v33, %v1174_v34 }
 0x23f   :  { %v1201_v36 = vmax.f32 %v1198_v35, 0.0 }
 0x241   :  { %v1204_v37 = vpack.c.bf16 %v1201_v36, %v1201_v36 }
 0x243   :  { %1841 = vmatmul.mubr.bf16.vlgmr.msra.gmra.mrb[16].mxu1 %v1204_v37 }
 0x2f5   :  { %v1801_v20 = vpop.f32.mrb[16].mxu0 }
 0x2f6   :  { %v1802_v38 = vpop.f32.mrb[17].mxu0 }
 0x2f7   :  { %v1803_v39 = vadd.f32 %v1802_v38, %v1801_v20  ;;  %v1804_v40 = vpop.f32.mrb[18].mxu0 }
 0x2f8   :  { %v1805_v41 = vpop.f32.mrb[19].mxu0 }
 0x2f9   :  { %v1439_v43 = vadd.f32 %v1803_v39, %v1714_v42 }
 0x316   :  { %v1478_v44 = vpop.f32.mrb[16].mxu1 }
 0x317   :  { %v1479_v63 = vadd.f32 %v1478_v44, %v1439_v43  ;;  %v1842_v45 = vpop.f32.mrb[17].mxu1 }
 0x318   :  { %v1481_v28 = vpop.f32.mrb[18].mxu1 }
 0x319   :  { %v1843_v30 = vpop.f32.mrb[19].mxu1  ;;  %1486 = vmax.xlane.f32.xlu0 %v1479_v63  ;;  %v1484_v46 = vpack.c.bf16 %v1479_v63, %v1479_v63 }
 0x31b   :  { %1485 = vst [vmem:[#allocation11] sm:$0xf] %v1484_v46 }
 0x3a6   :  { %v1487_v47 = vpop.xlane.xlu0 %1486 }
 0x3a7   :  { %v1488_v48 = vsub.f32 %v1479_v63, %v1487_v47 }
 0x3a9   :  { %v1489_v49 = vmul.f32 1.442695, %v1488_v48 }
 0x3ab   :  { %2030 = vpow2.f32 %v1489_v49 }
 0x3b5   :  { %v2031_v50 = vpop.eup %2030 }
 0x3b6   :  { %1845 = vmatpush3.xpose.msra.mxu0 %v2031_v50 }
 0x3b9   :  { %1847 = vmatmul.mubr.f32.vlgmr.msra.gmra.mrb[20].mxu0 %v1491_v51 }
 0x3ba   :  { %2155 = shalt.err (!%p2152_p2)
}
 0x3bb   :  { %s2156_s13 = scalar_lea.hbm %s2458_s10, 64 }
 0x3bc   :  { %p2157_p3 = scmp.ne.s32.totalorder %s2458_s10, %s2156_s13  ;;  %p2160_p4 = scmp.lt.u32.totalorder %s2156_s13, %s2458_s10 }
 0x3be   :  { %p2162_p5 = pnand %p2160_p4, %p2157_p3 }
 0x3c0   :  { %2165 = shalt.err (!%p2162_p5)
}
 0x3c1   :  { %1578 = dma.vmem_to_hbm [thread:$0]  %s1576_s28, 64, %s2458_s10, [#allocation4]   ;;  %vm1567_vm4 = vcmask 57344  }
 0x3c2   :  { %s2213_s17 = smov [#allocation12]  }
 0x3c3   :  { %s1585_s2 = sshll.u32 %s2213_s17, 4  ;;  %s1586_s2 = int_to_ptr.vmem [resolvable:$true] %s1585_s2 }
 0x3c4   :  { %s2166_s27 = scalar_lea.vmem %s1586_s2, 16  ;;  %s2170_s19 = scalar_lea.vmem %s1586_s2, 32 }
 0x3c5   :  { %p2167_p6 = scmp.ne.s32.totalorder %s1586_s2, %s2166_s27  ;;  %p2171_p7 = scmp.lt.s32.totalorder %s1586_s2, %s1586_s2 }
 0x3c6   :  { %p2172_p8 = scmp.lt.s32.totalorder %s2170_s19, %s2166_s27 }
 0x3c8   :  { %p2173_p9 = por %p2172_p8, %p2171_p7 }
 0x3ca   :  { %p2174_p10 = pnand %p2173_p9, %p2167_p6 }
 0x48c   :  { %v1558_v52 = vpop.f32.mrb[20].mxu0 }
 0x48d   :  { %2032 = vrcp.f32 %v1558_v52  ;;  %v1848_v53 = vpop.f32.mrb[21].mxu0 }
 0x497   :  { %v2033_v54 = vpop.eup %2032 }
 0x498   :  { %v1564_v55 = vrot.slane %v2033_v54, 1 }
 0x49a   :  { %v1566_v56 = vmul.f32 %v1564_v55, %v1558_v52 }
 0x49c   :  { %1568 = vst.msk [vmem:[#allocation12] sm:$0x1] %vm1567_vm4, %v1566_v56 }
 0x49d   :  { %2177 = shalt.err (!%p2174_p10)
}
 0x49e   :  { %s2178_s7 = scalar_lea.hbm %s2459_s11, 16 }
 0x49f   :  { %p2179_p11 = scmp.ne.s32.totalorder %s2459_s11, %s2178_s7  ;;  %p2182_p12 = scmp.lt.u32.totalorder %s2178_s7, %s2459_s11 }
 0x4a1   :  { %p2184_p13 = pnand %p2182_p12, %p2179_p11 }
 0x4a3   :  { %2187 = shalt.err (!%p2184_p13)
}
 0x4a4   :  { %1588 = dma.vmem_to_hbm [thread:$0]  %s1586_s2, 16, %s2459_s11, [#allocation13]  }
 0x4a5   :  { %2194 = dma.done.wait [#allocation4], 64  }
 0x4a6   :  { %2195 = vsyncadd [#allocation4], 4294967232 }
 0x4a7   :  { %2196 = dma.done.wait [#allocation13], 16  }
 0x4a8   :  { %2197 = vsyncadd [#allocation13], 4294967280 }
 0x4a9   :  { %1595 = vsyncpa [#allocation3], 1 }
 0x4aa   :  { %1596 = vsyncpa [#allocation6], 1 }
 0x4ab   :  { %1597 = vsyncpa [#allocation9], 1 }
 0x4ac   :  { %1598 = vsyncpa [#allocation4], 1 }
 0x4ad   :  { %1599 = vsyncpa [#allocation13], 1 }

</bundles_post_ra>
